<compile_context>
chip_gen: v6e
topology: v6e:2x2x1
jax: 0.10.0
libtpu: 0.0.40
codegen_flags: <defaults>
</compile_context>

<pallas_src>
from functools import partial

import jax
import jax.numpy as jnp
from jax.experimental import pallas as pl
from jax.experimental.pallas import tpu as pltpu
import numpy as np


# ---------------------------------------------------------------------------
# Fused single-pass kernel: pool + gate MLP + gated multiply, one HBM pass.
# ---------------------------------------------------------------------------
def gam_fused_kernel(fs_ref, m_ref, w1t_ref, b1_ref, w2_ref, b2_ref, out_ref):
    # fs_ref : (1, C, HW)  feature slab for one batch item (HW on lanes)
    # m_ref  : (1, 1, HW)  nearest-resized mask (lane-dense)
    # w1t_ref: (C, C)      W1^T  (Cin on sublanes, Cout on lanes)
    # b1_ref : (1, C)
    # w2_ref : (C, C)      W2    (Cout on sublanes, Cin on lanes)
    # b2_ref : (C, 1)
    # out_ref: (1, C, HW)
    fs = fs_ref[0]                                            # (C, HW)
    m = m_ref[0]                                              # (1, HW) -> bcast over sublanes
    inv_hw = 1.0 / fs.shape[-1]                               # static

    # masked global average pool: (C, 1) column vector (lane reduction)
    att = jnp.sum(fs * m, axis=-1, keepdims=True) * inv_hw    # (C, 1)

    # layer 1: h[j] = relu( sum_k W1[j,k] * att[k] + b1[j] )  -> row (1, C)
    # (sublane reduction; no MXU, no transpose, robust for tiny C)
    h = jnp.maximum(
        jnp.sum(w1t_ref[...] * att, axis=0, keepdims=True) + b1_ref[...], 0.0)

    # layer 2: g[j] = sigmoid( sum_k W2[j,k] * h[k] + b2[j] ) -> column (C, 1)
    g = jax.nn.sigmoid(
        jnp.sum(w2_ref[...] * h, axis=-1, keepdims=True) + b2_ref[...])

    # gated output: gate column broadcasts over the lane (HW) axis
    out_ref[0] = fs * g


# ---------------------------------------------------------------------------
# Fallback pass 1: masked global-average pooling (accumulated over HW tiles).
# ---------------------------------------------------------------------------
def pool_kernel(fs_ref, m_ref, att_ref):
    # fs_ref : (1, C, T)   feature tile, HW on the lane axis
    # m_ref  : (1, 1, T)   lane-dense nearest-resized mask tile
    # att_ref: (1, C, 1)   resident accumulator across the HW-tile grid axis
    t = pl.program_id(1)

    @pl.when(t == 0)
    def _():
        att_ref[...] = jnp.zeros_like(att_ref)

    fs = fs_ref[0]                                        # (C, T)
    m = m_ref[0]                                          # (1, T) -> bcast over C sublanes
    partial_sum = jnp.sum(fs * m, axis=-1, keepdims=True)  # (C, 1) lane reduction
    att_ref[...] += partial_sum[None]                     # (1, C, 1)


# ---------------------------------------------------------------------------
# Fallback pass 2: gating multiply (pure mem-bound elementwise).
# ---------------------------------------------------------------------------
def gate_kernel(fs_ref, g_ref, out_ref):
    # fs_ref : (1, C, T), g_ref : (1, C, 1), out_ref : (1, C, T)
    out_ref[0] = fs_ref[0] * g_ref[0]                     # gate bcast over lanes


# ---------------------------------------------------------------------------
# Glue (plain JAX, no data-movement-heavy ops)
# ---------------------------------------------------------------------------
def _nearest_resize(mask, h, w):
    # Matches F.interpolate(mode='nearest'): src = floor(dst * in/out)
    b, hin, win = mask.shape
    ri = (jnp.arange(h) * hin // h).astype(jnp.int32)
    ci = (jnp.arange(w) * win // w).astype(jnp.int32)
    return mask[:, ri[:, None], ci[None, :]].astype(jnp.float32)


def _pick_hw_tile(HW, C, budget_bytes=2 * 1024 * 1024):
    """Largest HW tile (multiple of 128 dividing HW) with <= ~2 MiB per block."""
    if C * HW * 4 <= budget_bytes or HW % 128 != 0:
        return HW
    t = min(HW, max(128, (budget_bytes // (C * 4)) // 128 * 128))
    t = (t // 128) * 128
    while t >= 128:
        if HW % t == 0:
            return t
        t -= 128
    return HW


_VMEM_LIMIT = 48 * 1024 * 1024          # safe on v5e/v6e/v7x
_FUSED_SLAB_BYTES = 8 * 1024 * 1024     # 2 in + 2 out double-buffers -> ~32 MiB


@partial(jax.jit, static_argnames=("force_two_pass",))
def gam_forward(Fs, Ys, w1, b1, w2, b2, force_two_pass=False):
    """Fs: (B, C, H, W) float32 (NCHW, like PyTorch).  Ys: (B, Hm, Wm)."""
    B, C, H, W = Fs.shape
    HW = H * W

    fs = Fs.reshape(B, C, HW)                              # free reshape (no transpose)
    mask = _nearest_resize(Ys, H, W).reshape(B, 1, HW)     # lane-dense mask
    # TODO(synk): nn.Dropout(p=drop_rate) omitted (inference semantics => identity)

    slab_bytes = C * HW * 4
    use_fused = (not force_two_pass) and (slab_bytes <= _FUSED_SLAB_BYTES)

    if use_fused:
        # ---- Single HBM pass: pool + MLP + gate, per batch item -------------
        w1t = w1.T                                         # (Cin, Cout)
        b1r = b1.reshape(1, C)
        b2c = b2.reshape(C, 1)

        out = pl.pallas_call(
            gam_fused_kernel,
            out_shape=jax.ShapeDtypeStruct((B, C, HW), jnp.float32),
            grid=(B,),
            in_specs=[
                pl.BlockSpec((1, C, HW), lambda b: (b, 0, 0)),
                pl.BlockSpec((1, 1, HW), lambda b: (b, 0, 0)),
                pl.BlockSpec((C, C), lambda b: (0, 0)),
                pl.BlockSpec((1, C), lambda b: (0, 0)),
                pl.BlockSpec((C, C), lambda b: (0, 0)),
                pl.BlockSpec((C, 1), lambda b: (0, 0)),
            ],
            out_specs=pl.BlockSpec((1, C, HW), lambda b: (b, 0, 0)),
            compiler_params=pltpu.CompilerParams(
                dimension_semantics=("parallel",),
                vmem_limit_bytes=_VMEM_LIMIT),
            cost_estimate=pl.CostEstimate(
                flops=3 * B * C * HW + 4 * B * C * C,
                transcendentals=B * C,
                bytes_accessed=4 * (2 * B * C * HW + B * HW + 2 * C * C + 2 * C)),
        )(fs, mask, w1t, b1r, w2, b2c)
        return out.reshape(B, C, H, W)

    # ---- Fallback two-pass path (large C*HW) --------------------------------
    T = _pick_hw_tile(HW, C)
    n_t = HW // T

    # Pass 1: per-batch masked pooled attention
    att_raw = pl.pallas_call(
        pool_kernel,
        out_shape=jax.ShapeDtypeStruct((B, C, 1), jnp.float32),
        grid=(B, n_t),
        in_specs=[
            pl.BlockSpec((1, C, T), lambda b, t: (b, 0, t)),
            pl.BlockSpec((1, 1, T), lambda b, t: (b, 0, t)),
        ],
        out_specs=pl.BlockSpec((1, C, 1), lambda b, t: (b, 0, 0)),
        compiler_params=pltpu.CompilerParams(
            dimension_semantics=("parallel", "arbitrary"),
            vmem_limit_bytes=_VMEM_LIMIT),
        cost_estimate=pl.CostEstimate(
            flops=2 * B * C * HW, transcendentals=0,
            bytes_accessed=4 * (B * C * HW + B * HW + B * C)),
    )(fs, mask)

    # Tiny MLP (the two 1x1 convs) hoisted out of the grid
    att = att_raw[:, :, 0] * (1.0 / HW)                    # (B, C)
    h = jnp.maximum(att @ w1.T + b1, 0.0)                  # ReLU
    g = jax.nn.sigmoid(h @ w2.T + b2)                      # (B, C)
    g3 = g[:, :, None]                                     # (B, C, 1)

    # Pass 2: gated output
    out = pl.pallas_call(
        gate_kernel,
        out_shape=jax.ShapeDtypeStruct((B, C, HW), jnp.float32),
        grid=(B, n_t),
        in_specs=[
            pl.BlockSpec((1, C, T), lambda b, t: (b, 0, t)),
            pl.BlockSpec((1, C, 1), lambda b, t: (b, 0, 0)),
        ],
        out_specs=pl.BlockSpec((1, C, T), lambda b, t: (b, 0, t)),
        compiler_params=pltpu.CompilerParams(
            dimension_semantics=("parallel", "parallel"),
            vmem_limit_bytes=_VMEM_LIMIT),
        cost_estimate=pl.CostEstimate(
            flops=B * C * HW, transcendentals=0,
            bytes_accessed=4 * (2 * B * C * HW + B * C)),
    )(fs, g3)

    return out.reshape(B, C, H, W)                         # free reshape


def gam_reference(Fs, Ys, w1, b1, w2, b2):
    B, C, H, W = Fs.shape
    m = _nearest_resize(Ys, H, W)[:, None]                 # (B,1,H,W)
    att = jnp.mean(m * Fs, axis=(2, 3))                    # (B,C)
    h = jnp.maximum(att @ w1.T + b1, 0.0)
    g = jax.nn.sigmoid(h @ w2.T + b2)
    return g[:, :, None, None] * Fs


if __name__ == "__main__":
    key = jax.random.PRNGKey(0)
    B, C, H, W = 2, 4, 16, 16
    Hm, Wm = 8, 8

    k1, k2, k3, k4, k5, k6 = jax.random.split(key, 6)
    Fs = jax.random.normal(k1, (B, C, H, W), dtype=jnp.float32)
    Ys = (jax.random.uniform(k2, (B, Hm, Wm)) > 0.5).astype(jnp.float32)

    # deterministic synthetic params for the two 1x1 convs (Conv2d(C, C, 1))
    bound = 1.0 / np.sqrt(C)
    w1 = jax.random.uniform(k3, (C, C), minval=-bound, maxval=bound, dtype=jnp.float32)
    b1 = jax.random.uniform(k4, (C,), minval=-bound, maxval=bound, dtype=jnp.float32)
    w2 = jax.random.uniform(k5, (C, C), minval=-bound, maxval=bound, dtype=jnp.float32)
    b2 = jax.random.uniform(k6, (C,), minval=-bound, maxval=bound, dtype=jnp.float32)

    ref = jax.block_until_ready(gam_reference(Fs, Ys, w1, b1, w2, b2))

    # Fused single-pass path (the default for shapes that fit in VMEM)
    out_fused = jax.block_until_ready(gam_forward(Fs, Ys, w1, b1, w2, b2))
    np.testing.assert_allclose(np.asarray(out_fused), np.asarray(ref),
                               rtol=1e-5, atol=1e-5)

    # Two-pass fallback path (forced, so it is compile/run checked too)
    out_2pass = jax.block_until_ready(
        gam_forward(Fs, Ys, w1, b1, w2, b2, force_two_pass=True))
    np.testing.assert_allclose(np.asarray(out_2pass), np.asarray(ref),
                               rtol=1e-5, atol=1e-5)

    print("KERNEL_OK")
</pallas_src>

<mosaic_0001>
module attributes {stable_mosaic.version = 11 : i64} {
  func.func @gam_fused_kernel(%arg0: i32, %arg1: memref<1x4x256xf32, #tpu.memory_space<vmem>>, %arg2: memref<1x1x256xf32, #tpu.memory_space<vmem>>, %arg3: memref<4x4xf32, #tpu.memory_space<vmem>>, %arg4: memref<1x4xf32, #tpu.memory_space<vmem>>, %arg5: memref<4x4xf32, #tpu.memory_space<vmem>>, %arg6: memref<4x1xf32, #tpu.memory_space<vmem>>, %arg7: memref<1x4x256xf32, #tpu.memory_space<vmem>>) attributes {dimension_semantics = [#tpu.dimension_semantics<parallel>], iteration_bounds = array<i64: 2>, scalar_prefetch = 0 : i64, scratch_operands = 0 : i64, tpu.core_type = #tpu.core_type<tc>, window_params = [{transform_indices = @transform_0, window_bounds = array<i64: 1, 4, 256>}, {transform_indices = @transform_1, window_bounds = array<i64: 1, 1, 256>}, {pipeline_mode = #tpu.pipeline_mode<synchronous>, transform_indices = @transform_2, window_bounds = array<i64: 4, 4>}, {pipeline_mode = #tpu.pipeline_mode<synchronous>, transform_indices = @transform_3, window_bounds = array<i64: 1, 4>}, {pipeline_mode = #tpu.pipeline_mode<synchronous>, transform_indices = @transform_4, window_bounds = array<i64: 4, 4>}, {pipeline_mode = #tpu.pipeline_mode<synchronous>, transform_indices = @transform_5, window_bounds = array<i64: 4, 1>}, {transform_indices = @transform_6, window_bounds = array<i64: 1, 4, 256>}]} {
    %c0 = arith.constant 0 : index
    %c0_0 = arith.constant 0 : index
    %c0_1 = arith.constant 0 : index
    %0 = vector.load %arg1[%c0, %c0_0, %c0_1] : memref<1x4x256xf32, #tpu.memory_space<vmem>>, vector<1x4x256xf32>
    %1 = vector.shape_cast %0 : vector<1x4x256xf32> to vector<4x256xf32>
    %c0_2 = arith.constant 0 : index
    %c0_3 = arith.constant 0 : index
    %c0_4 = arith.constant 0 : index
    %2 = vector.load %arg2[%c0_2, %c0_3, %c0_4] : memref<1x1x256xf32, #tpu.memory_space<vmem>>, vector<1x1x256xf32>
    %3 = vector.shape_cast %2 : vector<1x1x256xf32> to vector<1x256xf32>
    %4 = vector.broadcast %3 : vector<1x256xf32> to vector<4x256xf32>
    %5 = arith.mulf %1, %4 : vector<4x256xf32>
    %cst = arith.constant dense<0.000000e+00> : vector<4xf32>
    %6 = vector.multi_reduction <add>, %5, %cst [1] : vector<4x256xf32> to vector<4xf32>
    %7 = vector.shape_cast %6 : vector<4xf32> to vector<4x1xf32>
    %cst_5 = arith.constant 3.906250e-03 : f32
    %8 = vector.broadcast %cst_5 : f32 to vector<4x1xf32>
    %9 = arith.mulf %7, %8 : vector<4x1xf32>
    %c0_6 = arith.constant 0 : index
    %c0_7 = arith.constant 0 : index
    %10 = vector.load %arg3[%c0_6, %c0_7] : memref<4x4xf32, #tpu.memory_space<vmem>>, vector<4x4xf32>
    %11 = vector.broadcast %9 : vector<4x1xf32> to vector<4x4xf32>
    %12 = arith.mulf %10, %11 : vector<4x4xf32>
    %cst_8 = arith.constant dense<0.000000e+00> : vector<4xf32>
    %13 = vector.multi_reduction <add>, %12, %cst_8 [0] : vector<4x4xf32> to vector<4xf32>
    %14 = vector.shape_cast %13 : vector<4xf32> to vector<1x4xf32>
    %c0_9 = arith.constant 0 : index
    %c0_10 = arith.constant 0 : index
    %15 = vector.load %arg4[%c0_9, %c0_10] : memref<1x4xf32, #tpu.memory_space<vmem>>, vector<1x4xf32>
    %16 = arith.addf %14, %15 : vector<1x4xf32>
    %cst_11 = arith.constant 0.000000e+00 : f32
    %17 = vector.broadcast %cst_11 : f32 to vector<1x4xf32>
    %18 = arith.maximumf %16, %17 : vector<1x4xf32>
    %c0_12 = arith.constant 0 : index
    %c0_13 = arith.constant 0 : index
    %19 = vector.load %arg5[%c0_12, %c0_13] : memref<4x4xf32, #tpu.memory_space<vmem>>, vector<4x4xf32>
    %20 = vector.broadcast %18 : vector<1x4xf32> to vector<4x4xf32>
    %21 = arith.mulf %19, %20 : vector<4x4xf32>
    %cst_14 = arith.constant dense<0.000000e+00> : vector<4xf32>
    %22 = vector.multi_reduction <add>, %21, %cst_14 [1] : vector<4x4xf32> to vector<4xf32>
    %23 = vector.shape_cast %22 : vector<4xf32> to vector<4x1xf32>
    %c0_15 = arith.constant 0 : index
    %c0_16 = arith.constant 0 : index
    %24 = vector.load %arg6[%c0_15, %c0_16] : memref<4x1xf32, #tpu.memory_space<vmem>>, vector<4x1xf32>
    %25 = arith.addf %23, %24 : vector<4x1xf32>
    %26 = arith.negf %25 : vector<4x1xf32>
    %27 = math.exp %26 : vector<4x1xf32>
    %cst_17 = arith.constant 1.000000e+00 : f32
    %28 = vector.broadcast %cst_17 : f32 to vector<4x1xf32>
    %29 = arith.addf %28, %27 : vector<4x1xf32>
    %30 = arith.divf %28, %29 : vector<4x1xf32>
    %31 = vector.broadcast %30 : vector<4x1xf32> to vector<4x256xf32>
    %32 = arith.mulf %1, %31 : vector<4x256xf32>
    %c0_18 = arith.constant 0 : index
    %c0_19 = arith.constant 0 : index
    %c0_20 = arith.constant 0 : index
    %33 = vector.load %arg7[%c0_18, %c0_19, %c0_20] : memref<1x4x256xf32, #tpu.memory_space<vmem>>, vector<1x4x256xf32>
    %34 = vector.shape_cast %33 : vector<1x4x256xf32> to vector<4x256xf32>
    %35 = vector.shape_cast %32 : vector<4x256xf32> to vector<1x4x256xf32>
    tpu.vector_store %arg7[%c0_18, %c0_19, %c0_20], %35 {strides = array<i32>} : memref<1x4x256xf32, #tpu.memory_space<vmem>>, vector<1x4x256xf32>,
    return
  }
  func.func @transform_0(%arg0: i32) -> (i32, i32, i32) {
    %c0_i32 = arith.constant 0 : i32
    %c0_i32_0 = arith.constant 0 : i32
    %c0_i32_1 = arith.constant 0 : i32
    return %arg0, %c0_i32, %c0_i32_0 : i32, i32, i32
  }
  func.func @transform_1(%arg0: i32) -> (i32, i32, i32) {
    %c0_i32 = arith.constant 0 : i32
    %c0_i32_0 = arith.constant 0 : i32
    %c0_i32_1 = arith.constant 0 : i32
    return %arg0, %c0_i32, %c0_i32_0 : i32, i32, i32
  }
  func.func @transform_2(%arg0: i32) -> (i32, i32) {
    %c0_i32 = arith.constant 0 : i32
    %c0_i32_0 = arith.constant 0 : i32
    %c0_i32_1 = arith.constant 0 : i32
    return %c0_i32, %c0_i32_0 : i32, i32
  }
  func.func @transform_3(%arg0: i32) -> (i32, i32) {
    %c0_i32 = arith.constant 0 : i32
    %c0_i32_0 = arith.constant 0 : i32
    %c0_i32_1 = arith.constant 0 : i32
    return %c0_i32, %c0_i32_0 : i32, i32
  }
  func.func @transform_4(%arg0: i32) -> (i32, i32) {
    %c0_i32 = arith.constant 0 : i32
    %c0_i32_0 = arith.constant 0 : i32
    %c0_i32_1 = arith.constant 0 : i32
    return %c0_i32, %c0_i32_0 : i32, i32
  }
  func.func @transform_5(%arg0: i32) -> (i32, i32) {
    %c0_i32 = arith.constant 0 : i32
    %c0_i32_0 = arith.constant 0 : i32
    %c0_i32_1 = arith.constant 0 : i32
    return %c0_i32, %c0_i32_0 : i32, i32
  }
  func.func @transform_6(%arg0: i32) -> (i32, i32, i32) {
    %c0_i32 = arith.constant 0 : i32
    %c0_i32_0 = arith.constant 0 : i32
    %c0_i32_1 = arith.constant 0 : i32
    return %arg0, %c0_i32, %c0_i32_0 : i32, i32, i32
  }
}

</mosaic_0001>

<bundles_post_ra>
// kernel: gam_forward.1
= control target key start
LH: loop header
LB: loop body
LE: loop exit
PB: predicated region body
PF: predicated region fallthrough
CT: control target
= control target key end

     0   :  { %s480_s21 = smov 0   ;;  %s520_s0 = inlined_call_operand.vmem [shape: f32[2,4,256], index: 0, kind: input, shape index: {}]   ;;  %s521_s1 = inlined_call_operand.vmem [shape: f32[2,1,256], index: 1, kind: input, shape index: {}]   ;;  %s522_s2 = inlined_call_operand.vmem [shape: f32[4,4], index: 2, kind: input, shape index: {}]   ;;  %s523_s3 = inlined_call_operand.vmem [shape: f32[1,4], index: 3, kind: input, shape index: {}]   ;;  %s524_s4 = inlined_call_operand.vmem [shape: f32[4,4], index: 4, kind: input, shape index: {}]   ;;  %s525_s5 = inlined_call_operand.vmem [shape: f32[4,1], index: 5, kind: input, shape index: {}]   ;;  %s526_s6 = inlined_call_operand.vmem [shape: f32[2,4,256], index: 6, kind: output, shape index: {}]  }
   0x1 LB: > { %s404_s22 = sadd.s32 4294967295, %s441_s21   ;;  %p408_p0 = scmp.ge.s32.totalorder %s441_s21, 1  ;;  %s441_s21 = sphi %s480_s21, %s16_s21  }
   0x2   : > { %p221_p1 = scmp.lt.s32.totalorder %s441_s21, 3 }
   0x4   : > { %p222_p2 = pnand %p408_p0, %p221_p1 }
   0x5   : > { %p255_p3 = scmp.lt.s32.totalorder (!%p222_p2), %s404_s22, 1 }
   0x6   : > { %225 = sbr.rel (%p222_p2) target bundleno = 493 (0x1ed), region = 44 }
   0xb   : > { %v272_v0 = vlaneseq  ;;  %s528_s22 = smov (!%p255_p3, %s404_s22), 1  ;;  %vm286_vm0 = vcmask 1043456   ;;  %v293_v14 = vld [vmem:[%s522_s2] sm:$0xf]  ;;  %vm295_vm1 = vcmask 27648   ;;  %v443_v32 = vmov 0  }
   0xc   : > { %s417_s23 = sshll.u32 %s528_s22, 3  ;;  %s411_s24 = sshll.u32 %s528_s22, 1  ;;  %v303_v24 = vld [vmem:[%s523_s3] sm:$0x1]  ;;  %429 = vset.pattern.permute.xlu1 %v443_v32  ;;  %430 = vset.pattern.permute.xlu0 %v443_v32  ;;  %v444_v40 = vmov 839922192  }
   0xd   : > { %v273_v1 = vshrl.u32 %v272_v0, 7  ;;  %s259_s27 = scalar_lea.vmem %s520_s0, %s417_s23  ;;  %s263_s30 = scalar_lea.vmem %s521_s1, %s411_s24  ;;  %v306_v28 = vld [vmem:[%s524_s4] sm:$0xf]  ;;  %v328_v41 = vunpack.c.l.s4 %v444_v40 }
   0xe   : > { %v270_v4 = vld [vmem:[%s263_s30] sm:$0x3]  ;;  %s268_s17 = scalar_lea.vmem %s526_s6, %s417_s23 }
   0xf   : > { %v274_v2 = vsub.s32 0, %v273_v1  ;;  %v278_v3 = vsub.s32 1, %v273_v1  ;;  %v269_v7 = vld [vmem:[%s259_s27] sm:$0xff]  ;;  %v329_v42 = vunpack.c.0.s8 %v328_v41 }
  0x10   : > { %v315_v33 = vld [vmem:[%s525_s5] sm:$0xf] }
  0x11   : > { %v275_v5 = vrot.slane %v270_v4, %v274_v2  ;;  %v279_v6 = vrot.slane %v270_v4, %v278_v3  ;;  %v332_v43 = vsub.s32 %v329_v42, %v273_v1 }
  0x13   : > { %v280_v8 = vcombine.low %v275_v5, %v279_v6 }
  0x15   : > { %v282_v9 = vmul.f32 %v280_v8, %v269_v7 }
  0x17   : > { %v284_v10 = vcombine.high %v282_v9, %v282_v9  ;;  %v287_v11 = vsel %vm286_vm0, %v282_v9, 0.0 }
  0x19   : > { %v288_v12 = vsel %vm286_vm0, %v284_v10, 0.0 }
  0x1a   : > { %v289_v13 = vadd.f32 %v288_v12, %v287_v11 }
  0x1c   : > { %290 = vadd.xlane.f32.xlu0 %v289_v13 }
  0xa5   : > { %v291_v15 = vpop.xlane.xlu0 %290 }
  0xa6   : > { %v292_v16 = vmul.f32 0.00390625, %v291_v15 }
  0xa8   : > { %v294_v17 = vmul.f32 %v293_v14, %v292_v16 }
  0xaa   : > { %v296_v18 = vsel %vm295_vm1, %v294_v17, 0.0 }
  0xab   : > { %v297_v19 = vrot.slane %v296_v18, 4 }
  0xad   : > { %v298_v20 = vadd.f32 %v297_v19, %v296_v18 }
  0xaf   : > { %v299_v21 = vrot.slane %v298_v20, 2 }
  0xb1   : > { %v300_v22 = vadd.f32 %v299_v21, %v298_v20 }
  0xb3   : > { %v301_v23 = vrot.slane %v300_v22, 1 }
  0xb5   : > { %v302_v25 = vadd.f32 %v301_v23, %v300_v22 }
  0xb7   : > { %v304_v26 = vadd.f32 %v303_v24, %v302_v25 }
  0xb9   : > { %v305_v27 = vmax.f32 %v304_v26, 0.0 }
  0xbb   : > { %v310_v29 = vrot.slane %v305_v27, %v274_v2 }
  0xbd   : > { %v311_v30 = vmul.f32 %v310_v29, %v306_v28 }
  0xbf   : > { %v312_v31 = vsel %vm295_vm1, %v311_v30, 0.0 }
  0xc0   : > { %313 = vadd.xlane.f32.xlu0 %v312_v31 }
 0x149   : > { %v314_v34 = vpop.xlane.xlu0 %313 }
 0x14a   : > { %v316_v35 = vadd.f32 %v315_v33, %v314_v34 }
 0x14c   : > { %v414_v36 = vmul.f32 -1.442695, %v316_v35 }
 0x14e   : > { %431 = vpow2.f32 %v414_v36 }
 0x15b   : > { %v432_v37 = vpop.eup %431 }
 0x15c   : > { %v320_v38 = vadd.f32 1.0, %v432_v37 }
 0x15e   : > { %433 = vrcp.f32 %v320_v38 }
 0x16b   : > { %v434_v39 = vpop.eup %433 }
 0x16c   : > { %325 = vperm.xlu1 %429, %v434_v39  }
 0x1e7   : > { %v326_v44 = vpop.permute.xlu1 %325 }
 0x1e8   : > { %v333_v45 = vrot.slane %v326_v44, %v332_v43 }
 0x1ea   : > { %v335_v46 = vmul.f32 %v333_v45, %v269_v7 }
 0x1ec   : > { %336 = vst [vmem:[%s268_s17] sm:$0xff] %v335_v46 }
 0x1ed PF: > { %s16_s21 = sadd.s32 1, %s441_s21  }
 0x1ee   : > { %p13_p4 = scmp.ge.s32.totalorder %s16_s21, 4  }
 0x1f0   :  { %15 = sbr.rel (!%p13_p4) target bundleno = 1 (0x1), region = 77 }

</bundles_post_ra>
